<compile_context>
chip_gen: v5e
topology: v5e:2x2
jax: 0.10.0
libtpu: 0.0.40
codegen_flags: <defaults>
</compile_context>

<pallas_src>
import math
import numpy as np
import jax
import jax.numpy as jnp
from jax.experimental import pallas as pl
from jax.experimental.pallas import tpu as pltpu

NEG_SLOPE = 0.2        # LeakyReLU negative slope (module default)
LANE = 128             # TPU lane width
NEG_BIG = -1e30        # mask fill (torch.sparse.softmax semantics)


def _round_up(x, m):
    return (x + m - 1) // m * m


def _vmem_budget_bytes():
    """Generation-aware VMEM budget (v7x: 64 MiB physical, v5e/v6e: 128 MiB)."""
    try:
        cap = int(pltpu.get_tpu_info().vmem_capacity_bytes)
    except Exception:
        cap = 64 * 1024 * 1024          # conservative (v7x-sized) fallback
    return int(min(96 * 2**20, max(32 * 2**20, (cap * 3) // 4)))


# ----------------------- kernel 1: fused projection -------------------------
def _proj_kernel(x_ref, w_ref, h_ref):
    # x: (TP, D_in) bf16 ; w: (D_in, D_PAD) bf16 with W@a_l, W@a_r folded into the
    # two spare columns at d_out / d_out+1 -> s_l / s_r come out of this one matmul.
    h_ref[...] = jnp.dot(x_ref[...], w_ref[...],
                         preferred_element_type=jnp.float32).astype(h_ref.dtype)


def project_pallas(x_all_bf16, w_pad_bf16, tp, vmem_limit):
    n_all_pad, d_in = x_all_bf16.shape
    d_pad = w_pad_bf16.shape[1]
    return pl.pallas_call(
        _proj_kernel,
        out_shape=jax.ShapeDtypeStruct((n_all_pad, d_pad), jnp.bfloat16),
        grid=(n_all_pad // tp,),
        in_specs=[pl.BlockSpec((tp, d_in), lambda r: (r, 0)),
                  pl.BlockSpec((d_in, d_pad), lambda r: (0, 0))],
        out_specs=pl.BlockSpec((tp, d_pad), lambda r: (r, 0)),
        compiler_params=pltpu.CompilerParams(
            dimension_semantics=("parallel",),
            vmem_limit_bytes=vmem_limit),
    )(x_all_bf16, w_pad_bf16)


# ------------- kernel 2: masked per-type attention (flash-style) -------------
def _make_attn_kernel(tm, tn, n_gi, n_gj, resident_h_tail):
    def kernel(cnt_ref,                       # SMEM scalar prefetch: per-tile edge counts
               slt_ref, sr_ref, adj_ref, ht_ref,   # VMEM inputs
               out_ref,                            # VMEM output (lane-dense bf16)
               m_sc, l_sc, acc_sc):                # VMEM scratch
        t = pl.program_id(0)          # local edge type
        i = pl.program_id(1)          # head tile
        j = pl.program_id(2)          # tail tile (reduction axis)

        @pl.when(j == 0)
        def _init():
            m_sc[...] = jnp.full_like(m_sc, NEG_BIG)
            l_sc[...] = jnp.zeros_like(l_sc)
            acc_sc[...] = jnp.zeros_like(acc_sc)

        cnt = cnt_ref[(t * n_gi + i) * n_gj + j]

        @pl.when(cnt > 0)                         # skip empty (head, tail) tiles
        def _update():
            mask = adj_ref[...] > 0                       # int8 -> bool, computed once
            # s_l_t already contains the edge-type bias s_e[t] (added host-side)
            raw = slt_ref[...] + sr_ref[...]              # (TM,1)+(1,TN) -> (TM,TN) f32
            score = jnp.where(raw > 0, raw, NEG_SLOPE * raw)   # LeakyReLU (attn_drop = id)
            masked = jnp.where(mask, score, NEG_BIG)

            m_prev = m_sc[...]
            m_new = jnp.maximum(m_prev, jnp.max(masked, axis=1, keepdims=True))
            alpha = jnp.exp(m_prev - m_new)
            # the where() is load-bearing: keeps l == 0 for edge-less rows
            p = jnp.where(mask, jnp.exp(masked - m_new), 0.0)
            l_sc[...] = alpha * l_sc[...] + jnp.sum(p, axis=1, keepdims=True)
            if resident_h_tail:
                start = pl.multiple_of(j * tn, tn)
                h_blk = ht_ref[pl.ds(start, tn), :]
            else:
                h_blk = ht_ref[...]
            acc_sc[...] = alpha * acc_sc[...] + jnp.dot(
                p.astype(jnp.bfloat16), h_blk, preferred_element_type=jnp.float32)
            m_sc[...] = m_new

        @pl.when(j == n_gj - 1)
        def _finalize():
            denom = l_sc[...]
            inv = pl.reciprocal(denom, approx=True)       # EUP slot, essentially free
            # rows with no edges (denom == 0) -> zeros, like torch.sparse.softmax
            out_ref[...] = jnp.where(denom > 0.0, acc_sc[...] * inv,
                                     0.0).astype(out_ref.dtype)
    return kernel


def hgn_attention_pallas(counts, s_l_t, s_r, adj, h_tail, *, tm, tn, d_pad,
                         resident_h_tail, vmem_limit):
    n_local, n_h_pad, _ = s_l_t.shape
    n_t_pad = adj.shape[2]
    n_gi = n_h_pad // tm
    n_gj = n_t_pad // tn
    grid = (n_local, n_gi, n_gj)

    if resident_h_tail:
        # DMA'd once, reused across all edge types and head tiles
        ht_spec = pl.BlockSpec((n_t_pad, d_pad), lambda t, i, j, cnt: (0, 0))
    else:
        ht_spec = pl.BlockSpec((tn, d_pad), lambda t, i, j, cnt: (j, 0))

    grid_spec = pltpu.PrefetchScalarGridSpec(
        num_scalar_prefetch=1,
        grid=grid,
        in_specs=[
            pl.BlockSpec((None, tm, 1), lambda t, i, j, cnt: (t, i, 0)),   # s_l + s_e[t]
            pl.BlockSpec((1, tn), lambda t, i, j, cnt: (0, j)),            # s_r
            pl.BlockSpec((None, tm, tn), lambda t, i, j, cnt: (t, i, j)),  # adj (int8)
            ht_spec,                                                       # h_tail (bf16)
        ],
        # lane-dense bf16 output: (N_h_pad, n_local*D_PAD); column block = edge type
        out_specs=pl.BlockSpec((tm, d_pad), lambda t, i, j, cnt: (i, t)),
        scratch_shapes=[pltpu.VMEM((tm, 1), jnp.float32),      # running max
                        pltpu.VMEM((tm, 1), jnp.float32),      # running denominator
                        pltpu.VMEM((tm, d_pad), jnp.float32)], # running numerator
    )
    return pl.pallas_call(
        _make_attn_kernel(tm, tn, n_gi, n_gj, resident_h_tail),
        out_shape=jax.ShapeDtypeStruct((n_h_pad, n_local * d_pad), jnp.bfloat16),
        grid_spec=grid_spec,
        compiler_params=pltpu.CompilerParams(
            dimension_semantics=("parallel", "parallel", "arbitrary"),
            vmem_limit_bytes=vmem_limit),
    )(counts, s_l_t, s_r, adj, h_tail)


# --------------------------- pure-JAX reference -----------------------------
def _ref_hgn_split(x_head, x_tail, w_t, a_l, a_r, s_e_all, unique_types,
                   head_ind, tail_ind, local_t):
    """Reference with the same bf16 matmul-operand casts as the kernels."""
    bf = jnp.bfloat16
    n_h, n_t = x_head.shape[0], x_tail.shape[0]
    h_head = jnp.dot(x_head.astype(bf), w_t.astype(bf), preferred_element_type=jnp.float32)
    h_tail = jnp.dot(x_tail.astype(bf), w_t.astype(bf), preferred_element_type=jnp.float32)
    s_l = jnp.sum(h_head * a_l, -1, keepdims=True)
    s_r = jnp.sum(h_tail * a_r, -1, keepdims=True)
    outs = []
    for li, gt in enumerate(unique_types):
        sel = local_t == li
        mask = np.zeros((n_h, n_t), np.float32)
        mask[head_ind[sel], tail_ind[sel]] = 1.0
        mask = jnp.asarray(mask)
        raw = s_l + s_r.T + s_e_all[gt]
        score = jnp.where(raw > 0, raw, NEG_SLOPE * raw)
        masked = jnp.where(mask > 0, score, NEG_BIG)
        m = masked.max(1, keepdims=True)
        p = jnp.where(mask > 0, jnp.exp(masked - m), 0.0)
        den = p.sum(1, keepdims=True)
        attn = jnp.where(den > 0, p / den, 0.0)
        outs.append(jnp.dot(attn.astype(bf), h_tail.astype(bf),
                            preferred_element_type=jnp.float32))
    return jnp.stack(outs, axis=-2)                 # (N_h, n_local, D_out)


# ------------------------------ parameters ----------------------------------
def _reset(key, shape):
    # reset_parameters(): uniform(-stdv, stdv), stdv = sqrt(6/(dim[-2]+dim[-1]))
    stdv = math.sqrt(6.0 / (shape[-2] + shape[-1]))
    return jax.random.uniform(key, shape, jnp.float32, -stdv, stdv)


def build_layer0_params(key, node_types, n_rel, edge_feats_len, in_len, out_len):
    keys = jax.random.split(key, 5 + len(node_types))
    p = {
        'edge_emb': _reset(keys[0], (n_rel, edge_feats_len)),
        'W_e': _reset(keys[1], (edge_feats_len, edge_feats_len)),
        'a_l': _reset(keys[2], (1, out_len)),        # torch shape (1,1,out_len)
        'a_r': _reset(keys[3], (1, out_len)),
        'a_e': _reset(keys[4], (1, edge_feats_len)),
        'W': {},
    }
    for i, nt in enumerate(node_types):
        p['W'][nt] = _reset(keys[5 + i], (out_len, in_len))   # nn.Linear weight layout
    return p
    # TODO(synk): a_relation (nn.Linear) is only *returned* (never applied) in the
    # split-edge branch, so it is not materialized here.


# ----------------------- SimpleHGNLayer (split-edge) ------------------------
def simple_hgn_split_forward(d, params, srctype, n_rel, *, tm_cap=1024, tn_cap=512,
                             debug_check=False):
    x_head = d['head_feature']                       # feat_drop == identity (eval)
    x_tail = jnp.concatenate(d['tail_feature'], 0)
    edge_list = jnp.concatenate(d['Adj'], 1)
    tmp_edge = np.concatenate([np.asarray(t) for t in d['tmp_edge_index']])
    head_ind, tail_ind = edge_list[0], edge_list[1]
    n_h, n_t = x_head.shape[0], x_tail.shape[0]
    d_in = x_head.shape[1]

    # local (per-srctype) edge types, in torch.unique (ascending) order
    unique_types = sorted(set(int(v) for v in np.unique(tmp_edge)))
    n_local = len(unique_types)
    g2l = {gt: li for li, gt in enumerate(unique_types)}
    local_t = np.array([g2l[int(v)] for v in tmp_edge], np.int32)

    w_t = params['W'][srctype].T                     # (D_in, D_out)
    d_out = w_t.shape[1]

    vmem_budget = _vmem_budget_bytes()

    # D_PAD leaves >= 2 spare lanes for the folded a_l / a_r score columns
    D_PAD = _round_up(d_out, LANE)
    if D_PAD - d_out < 2:
        D_PAD += LANE

    # ---- tail tile (lane axis of the int8 adjacency): multiple of 128
    TN = min(tn_cap, _round_up(n_t, LANE))
    n_t_pad = _round_up(n_t, TN)

    # ---- keep h_tail fully VMEM-resident when it comfortably fits the budget
    resident_h_tail = (2 * n_t_pad * D_PAD * 2) <= vmem_budget // 4

    # ---- head tile: as big as VMEM allows (TM is the h_tail reuse factor), but keep
    #      >= 2 parallel grid blocks so both v7x TensorCores get work.
    TM = min(tm_cap, _round_up(n_h, 32))             # int8 adj needs sublane mult of 32

    def _attn_step_bytes(tm, tn):
        b = 2 * tm * tn                      # adj int8, double-buffered
        b += 2 * tm * D_PAD * 2              # bf16 out, double-buffered
        b += tm * D_PAD * 4 + 2 * tm * 4     # acc / m / l scratch
        b += 2 * (tm * 4 + tn * 4)           # s_l_t / s_r blocks
        b += (2 * n_t_pad * D_PAD * 2) if resident_h_tail else (2 * tn * D_PAD * 2)
        return b

    while TM > 32 and _attn_step_bytes(TM, TN) > (vmem_budget * 3) // 4:
        TM = max(32, ((TM // 2) // 32) * 32)
    while TM > 32 and n_local * pl.cdiv(n_h, TM) < 2:
        TM = max(32, ((TM // 2) // 32) * 32)
    n_h_pad = _round_up(n_h, TM)
    n_gi = n_h_pad // TM
    n_gj = n_t_pad // TN

    # ---- int8 adjacency mask + per-tile edge counts (empty-tile skip)
    local_t_j = jnp.asarray(local_t)
    adj = jnp.zeros((n_local, n_h_pad, n_t_pad), jnp.int8)
    adj = adj.at[local_t_j, head_ind, tail_ind].set(1)
    # TODO(synk): for large sparse graphs, replace the dense int8 mask (O(N^2) build +
    # HBM stream) with bit-packed lanes or scalar-prefetched CSR tiles so empty tiles
    # skip the DMA as well (biggest remaining win on v5e's slower HBM).
    tile_flat = (local_t_j * n_gi + head_ind // TM) * n_gj + tail_ind // TN
    counts = jnp.zeros((n_local * n_gi * n_gj,), jnp.int32).at[tile_flat].add(1)

    # ---- edge-type bias hoisted out of the kernel: (a_e * (edge_emb @ W_e)).sum(-1)
    e = jnp.dot(params['edge_emb'], params['W_e'])
    s_e_all = jnp.sum(params['a_e'] * e, axis=-1)                  # (n_rel,)
    s_e_local = s_e_all[jnp.asarray(unique_types, jnp.int32)]      # (n_local,)

    # ---- fused head+tail projection (single MXU matmul); a_l/a_r folded into spare
    #      weight columns so s_l/s_r fall out of the matmul with no extra outputs.
    x_head_p = jnp.zeros((n_h_pad, d_in), jnp.float32).at[:n_h].set(x_head)
    x_tail_p = jnp.zeros((n_t_pad, d_in), jnp.float32).at[:n_t].set(x_tail)
    n_all = n_h_pad + n_t_pad
    TP = min(1024, _round_up(n_all, 32))
    while TP > 32 and 2 * TP * (d_in + D_PAD) * 2 > vmem_budget // 2:
        TP = max(32, ((TP // 2) // 32) * 32)
    n_all_pad = _round_up(n_all, TP)
    x_all = (jnp.zeros((n_all_pad, d_in), jnp.float32)
             .at[:n_all].set(jnp.concatenate([x_head_p, x_tail_p], 0))
             .astype(jnp.bfloat16))
    w_pad = jnp.zeros((d_in, D_PAD), jnp.float32).at[:, :d_out].set(w_t)
    w_pad = w_pad.at[:, d_out].set(w_t @ params['a_l'][0])        # column -> s_l
    w_pad = w_pad.at[:, d_out + 1].set(w_t @ params['a_r'][0])    # column -> s_r
    w_pad = w_pad.astype(jnp.bfloat16)

    h_all = project_pallas(x_all, w_pad, TP, vmem_budget)         # (n_all_pad, D_PAD) bf16
    h_head = h_all[:n_h_pad]
    h_tail = h_all[n_h_pad:n_h_pad + n_t_pad]                     # (n_t_pad, D_PAD) bf16
    s_l = h_head[:, d_out:d_out + 1].astype(jnp.float32)          # (n_h_pad, 1)
    s_r = h_tail[:, d_out + 1:d_out + 2].astype(jnp.float32).T    # (1, n_t_pad)
    # pre-add the edge-type bias (saves one (TM,TN) VPU add per grid step)
    s_l_t = s_l[None, :, :] + s_e_local[:, None, None]            # (n_local, n_h_pad, 1)

    # ---- masked per-edge-type attention + aggregation (flash-style)
    out_pad = hgn_attention_pallas(counts, s_l_t, s_r, adj, h_tail,
                                   tm=TM, tn=TN, d_pad=D_PAD,
                                   resident_h_tail=resident_h_tail,
                                   vmem_limit=vmem_budget)
    out = (out_pad.reshape(n_h_pad, n_local, D_PAD)[:n_h, :, :d_out]
           .astype(jnp.float32))

    if debug_check:   # correctness check is NOT part of the hot path
        ref = _ref_hgn_split(x_head, x_tail, w_t, params['a_l'], params['a_r'],
                             s_e_all, unique_types, np.asarray(head_ind),
                             np.asarray(tail_ind), local_t)
        # bf16-class tolerance: bf16 matmul operands + bf16-folded attention scores
        np.testing.assert_allclose(np.asarray(out), np.asarray(ref),
                                   rtol=2e-2, atol=3e-2)

    res = jnp.zeros_like(x_head)                     # node_residual=False at layer 0
    gate_input_feature = jnp.concatenate([x_head, x_head], -1)
    return {'out': out, 'res': res, 'gate_input_feature': gate_input_feature}


# ------------------------- HGB_MTL_Layer (level 0) --------------------------
def hgb_mtl_layer_forward(graph, params, all_relation_list, *, tm_cap=1024,
                          tn_cap=512, debug_check=False):
    h = {nt: feat for nt, feat in graph['node_feat'].items()}
    per_src, adj_begin = {}, {}
    for (src, et, dst) in graph['canonical_etypes']:
        if src not in per_src:
            per_src[src] = {'head_feature': h[src], 'tail_feature': [],
                            'Adj': [], 'tmp_edge_index': [], 'res_attn': None}
            adj_begin[src] = 0
        tail_feat = h[dst]
        heads, tails = graph['edges'][et]
        tails = tails + adj_begin[src]
        adj_begin[src] += tail_feat.shape[0]
        per_src[src]['tail_feature'].append(tail_feat)
        per_src[src]['Adj'].append(jnp.stack([heads, tails]))
        idx = all_relation_list.index(et)
        per_src[src]['tmp_edge_index'].append(
            jnp.full((heads.shape[0],), idx, dtype=jnp.int32))

    inter = {}
    for src, d in per_src.items():
        inter[src] = simple_hgn_split_forward(d, params, src,
                                              len(all_relation_list),
                                              tm_cap=tm_cap, tn_cap=tn_cap,
                                              debug_check=debug_check)
        per_src[src]['tail_feature'] = []
    return inter, h, per_src


# --------------------------------- main --------------------------------------
def make_graph(key, n_users=8, n_items=200, feat_dim=32):
    k1, k2 = jax.random.split(key)
    node_feat = {
        'user': jax.random.normal(k1, (n_users, feat_dim), jnp.float32),
        'item': jax.random.normal(k2, (n_items, feat_dim), jnp.float32),
    }
    u = np.arange(n_users)
    it = np.arange(n_items)
    follows = (np.concatenate([u, u]),
               np.concatenate([(u + 1) % n_users, (u + 3) % n_users]))
    # spread buy targets so tail tiles 0 and 1 both get edges (exercises the
    # online-softmax carry and the empty-tile skip path with tn_cap=128)
    buys = (np.concatenate([u, u]),
            np.concatenate([(13 * u) % n_items, (29 * u + 77) % n_items]))
    bought_by = (it, it % n_users)
    to_j = lambda a: jnp.asarray(a, jnp.int32)
    edges = {'follows': (to_j(follows[0]), to_j(follows[1])),
             'buys': (to_j(buys[0]), to_j(buys[1])),
             'bought_by': (to_j(bought_by[0]), to_j(bought_by[1]))}
    canonical_etypes = [('user', 'follows', 'user'),
                        ('user', 'buys', 'item'),
                        ('item', 'bought_by', 'user')]
    return {'node_feat': node_feat, 'edges': edges,
            'canonical_etypes': canonical_etypes}


if __name__ == "__main__":
    key = jax.random.PRNGKey(0)
    k_graph, k_param = jax.random.split(key)

    node_feature_hid_len = 32   # in_features_len for layer 0
    GAT_hid_len = 32            # out_features_len
    edge_feats_len = 8
    all_relation_list = ['follows', 'buys', 'bought_by']
    node_types = ['user', 'item']

    n_users, n_items = 8, 200
    graph = make_graph(k_graph, n_users=n_users, n_items=n_items,
                       feat_dim=node_feature_hid_len)
    params = build_layer0_params(k_param, node_types,
                                 n_rel=len(all_relation_list),
                                 edge_feats_len=edge_feats_len,
                                 in_len=node_feature_hid_len,
                                 out_len=GAT_hid_len)

    # tn_cap=128 forces multiple tail tiles for the 'user' source so the online-softmax
    # carry, the empty-tile skip and the multi-head-tile paths are all exercised.
    inter, feature_before_agg, per_src = hgb_mtl_layer_forward(
        graph, params, all_relation_list, tn_cap=128, debug_check=True)

    for src in inter:
        jax.block_until_ready(inter[src]['out'])

    # shape sanity: user has 2 local edge types, item has 1
    assert inter['user']['out'].shape == (n_users, 2, GAT_hid_len)
    assert inter['item']['out'].shape == (n_items, 1, GAT_hid_len)

    print("KERNEL_OK")
</pallas_src>

<mosaic_0001>
module attributes {stable_mosaic.version = 11 : i64} {
  func.func @_proj_kernel(%arg0: i32, %arg1: memref<288x32xbf16, #tpu.memory_space<vmem>>, %arg2: memref<32x128xbf16, #tpu.memory_space<vmem>>, %arg3: memref<288x128xbf16, #tpu.memory_space<vmem>>) attributes {dimension_semantics = [#tpu.dimension_semantics<parallel>], iteration_bounds = array<i64: 1>, scalar_prefetch = 0 : i64, scratch_operands = 0 : i64, tpu.core_type = #tpu.core_type<tc>, window_params = [{transform_indices = @transform_0, window_bounds = array<i64: 288, 32>}, {pipeline_mode = #tpu.pipeline_mode<synchronous>, transform_indices = @transform_1, window_bounds = array<i64: 32, 128>}, {transform_indices = @transform_2, window_bounds = array<i64: 288, 128>}]} {
    %c0 = arith.constant 0 : index
    %c0_0 = arith.constant 0 : index
    %0 = vector.load %arg1[%c0, %c0_0] : memref<288x32xbf16, #tpu.memory_space<vmem>>, vector<288x32xbf16>
    %c0_1 = arith.constant 0 : index
    %c0_2 = arith.constant 0 : index
    %1 = vector.load %arg2[%c0_1, %c0_2] : memref<32x128xbf16, #tpu.memory_space<vmem>>, vector<32x128xbf16>
    %cst = arith.constant dense<0.000000e+00> : vector<288x128xf32>
    %2 = tpu.matmul %0, %1, %cst {dimension_numbers = #tpu.dot_dimension_numbers<[1], [0], [0], [1], [0, 0, 1, 1], [], []>} : vector<288x32xbf16>, vector<32x128xbf16>, vector<288x128xf32> -> vector<288x128xf32>
    %3 = arith.truncf %2 : vector<288x128xf32> to vector<288x128xbf16>
    %c0_3 = arith.constant 0 : index
    %c0_4 = arith.constant 0 : index
    %4 = vector.load %arg3[%c0_3, %c0_4] : memref<288x128xbf16, #tpu.memory_space<vmem>>, vector<288x128xbf16>
    tpu.vector_store %arg3[%c0_3, %c0_4], %3 {strides = array<i32>} : memref<288x128xbf16, #tpu.memory_space<vmem>>, vector<288x128xbf16>,
    return
  }
  func.func @transform_0(%arg0: i32) -> (i32, i32) {
    %c0_i32 = arith.constant 0 : i32
    %c0_i32_0 = arith.constant 0 : i32
    return %arg0, %c0_i32 : i32, i32
  }
  func.func @transform_1(%arg0: i32) -> (i32, i32) {
    %c0_i32 = arith.constant 0 : i32
    %c0_i32_0 = arith.constant 0 : i32
    %c0_i32_1 = arith.constant 0 : i32
    return %c0_i32, %c0_i32_0 : i32, i32
  }
  func.func @transform_2(%arg0: i32) -> (i32, i32) {
    %c0_i32 = arith.constant 0 : i32
    %c0_i32_0 = arith.constant 0 : i32
    return %arg0, %c0_i32 : i32, i32
  }
}

</mosaic_0001>

<bundles_post_ra>
// kernel: tpu_custom_call.1
= control target key start
LH: loop header
LB: loop body
LE: loop exit
PB: predicated region body
PF: predicated region fallthrough
CT: control target
= control target key end

     0   :  { %s758_s0 = inlined_call_operand.vmem [shape: bf16[288,32], index: 0, kind: input, shape index: {}]   ;;  %s759_s1 = inlined_call_operand.vmem [shape: bf16[32,128], index: 1, kind: input, shape index: {}]   ;;  %s760_s2 = inlined_call_operand.hbm [shape: bf16[288,128], index: 2, kind: output, shape index: {}]  }
   0x1   :  { %v516_v0 = vld [vmem:[%s759_s1 + $0x8] sm:$0xff]  ;;  %v515_v1 = vld [vmem:[%s759_s1] sm:$0xff] }
   0x2   :  { %216 = vmatpush.bf16.msra.mxu0 %v516_v0  ;;  %624 = vmatpush.bf16.msra.mxu1 %v516_v0 }
   0x3   :  { %625 = vmatpush.bf16.msra.mxu2 %v516_v0  ;;  %626 = vmatpush.bf16.msra.mxu3 %v516_v0 }
   0x4   :  { %7 = vsyncpa [#allocation3], 0  ;;  %v497_v2 = vld [vmem:[%s758_s0] sm:$0xff]  ;;  %v502_v3 = vld [vmem:[%s758_s0 + $0x28] sm:$0xff]  ;;  %vm155_vm0 = vcmask 261120   ;;  %s387_s22 = sshll.u32 %s760_s2, 4  ;;  %s388_s22 = int_to_ptr.hbm [resolvable:$true] %s387_s22 }
   0x5   :  { %v507_v4 = vld [vmem:[%s758_s0 + $0x50] sm:$0xff]  ;;  %v512_v5 = vld [vmem:[%s758_s0 + $0x78] sm:$0xff]  ;;  %v498_v6 = vld [vmem:[%s758_s0 + $0x8] sm:$0xff]  ;;  %s660_s23 = smov 64   ;;  %s661_s24 = smov 4  }
   0x6   :  { %217 = vmatpush.bf16.msra.mxu0 %v515_v1  ;;  %627 = vmatpush.bf16.msra.mxu1 %v515_v1  ;;  %v503_v7 = vld [vmem:[%s758_s0 + $0x30] sm:$0xff]  ;;  %v508_v8 = vld [vmem:[%s758_s0 + $0x58] sm:$0xff]  ;;  %v513_v9 = vld [vmem:[%s758_s0 + $0x80] sm:$0xff] }
   0x7   :  { %628 = vmatpush.bf16.msra.mxu2 %v515_v1  ;;  %629 = vmatpush.bf16.msra.mxu3 %v515_v1  ;;  %v499_v10 = vld [vmem:[%s758_s0 + $0x10] sm:$0xff]  ;;  %v504_v11 = vld [vmem:[%s758_s0 + $0x38] sm:$0xff]  ;;  %v509_v12 = vld [vmem:[%s758_s0 + $0x60] sm:$0xff] }
   0x8   :  { %v514_v13 = vld [vmem:[%s758_s0 + $0x88] sm:$0xff]  ;;  %v500_v14 = vld [vmem:[%s758_s0 + $0x18] sm:$0xff]  ;;  %v505_v15 = vld [vmem:[%s758_s0 + $0x40] sm:$0xff] }
   0x9   :  { %479 = vmatmul.msk.bf16.vlgmr.msra.gmra.mxu0 %vm155_vm0, %v497_v2  ;;  %484 = vmatmul.msk.bf16.vlgmr.msra.gmra.mxu1 %vm155_vm0, %v502_v3  ;;  %v510_v16 = vld [vmem:[%s758_s0 + $0x68] sm:$0xff]  ;;  %v501_v17 = vld [vmem:[%s758_s0 + $0x20] sm:$0xff]  ;;  %v511_v19 = vld [vmem:[%s758_s0 + $0x70] sm:$0xff] }
   0xa   :  { %489 = vmatmul.msk.bf16.vlgmr.msra.gmra.mxu2 %vm155_vm0, %v507_v4  ;;  %494 = vmatmul.msk.bf16.vlgmr.msra.gmra.mxu3 %vm155_vm0, %v512_v5  ;;  %v506_v18 = vld [vmem:[%s758_s0 + $0x48] sm:$0xff]  ;;  %s659_s0 = smov [#allocation2]  }
   0xb   :  { %s385_s1 = sshll.u32 %s659_s0, 4  ;;  %s386_s1 = int_to_ptr.vmem [resolvable:$true] %s385_s1 }
  0x19   :  { %480 = vmatmul.msk.bf16.gmra.mxu0 %vm155_vm0, %v498_v6  ;;  %485 = vmatmul.msk.bf16.gmra.mxu1 %vm155_vm0, %v503_v7 }
  0x1a   :  { %490 = vmatmul.msk.bf16.gmra.mxu2 %vm155_vm0, %v508_v8  ;;  %495 = vmatmul.msk.bf16.gmra.mxu3 %vm155_vm0, %v513_v9 }
  0x29   :  { %481 = vmatmul.msk.bf16.gmra.mxu0 %vm155_vm0, %v499_v10  ;;  %486 = vmatmul.msk.bf16.gmra.mxu1 %vm155_vm0, %v504_v11 }
  0x2a   :  { %491 = vmatmul.msk.bf16.gmra.mxu2 %vm155_vm0, %v509_v12  ;;  %496 = vmatmul.msk.bf16.gmra.mxu3 %vm155_vm0, %v514_v13 }
  0x39   :  { %482 = vmatmul.msk.bf16.gmra.mxu0 %vm155_vm0, %v500_v14  ;;  %487 = vmatmul.msk.bf16.gmra.mxu1 %vm155_vm0, %v505_v15 }
  0x3a   :  { %492 = vmatmul.msk.bf16.gmra.mxu2 %vm155_vm0, %v510_v16 }
  0x49   :  { %483 = vmatmul.msk.bf16.gmra.mxu0 %vm155_vm0, %v501_v17  ;;  %488 = vmatmul.msk.bf16.gmra.mxu1 %vm155_vm0, %v506_v18 }
  0x4a   :  { %493 = vmatmul.msk.bf16.gmra.mxu2 %vm155_vm0, %v511_v19 }
  0x86   :  { %v219_v20 = vpop.f32.mrf.mxu0  ;;  %v244_v21 = vpop.f32.mrf.mxu1 }
  0x8d   :  { %v269_v22 = vpop.f32.mrf.mxu2  ;;  %v294_v23 = vpop.f32.mrf.mxu3 }
  0x8e   :  { %v221_v24 = vpop.f32.mrf.mxu0  ;;  %v246_v25 = vpop.f32.mrf.mxu1 }
  0x8f   :  { %v520_v26 = vpack.c.bf16 %v221_v24, %v219_v20  ;;  %v545_v27 = vpack.c.bf16 %v246_v25, %v244_v21 }
  0x91   :  { %521 = vst [vmem:[#allocation2] sm:$0xff] %v520_v26  }
  0x92   :  { %611 = vst [vmem:[#allocation2 + $0x28] sm:$0xff] %v545_v27  }
  0x95   :  { %v271_v28 = vpop.f32.mrf.mxu2  ;;  %v296_v29 = vpop.f32.mrf.mxu3 }
  0x96   :  { %v570_v30 = vpack.c.bf16 %v271_v28, %v269_v22  ;;  %v224_v31 = vpop.f32.mrf.mxu0  ;;  %v249_v32 = vpop.f32.mrf.mxu1  ;;  %v595_v33 = vpack.c.bf16 %v296_v29, %v294_v23 }
  0x98   :  { %616 = vst [vmem:[#allocation2 + $0x50] sm:$0xff] %v570_v30  }
  0x99   :  { %621 = vst [vmem:[#allocation2 + $0x78] sm:$0xff] %v595_v33  }
  0x9d   :  { %v274_v34 = vpop.f32.mrf.mxu2  ;;  %v299_v35 = vpop.f32.mrf.mxu3 }
  0x9e   :  { %v226_v36 = vpop.f32.mrf.mxu0  ;;  %v251_v37 = vpop.f32.mrf.mxu1 }
  0x9f   :  { %v525_v38 = vpack.c.bf16 %v226_v36, %v224_v31  ;;  %v550_v39 = vpack.c.bf16 %v251_v37, %v249_v32 }
  0xa1   :  { %607 = vst [vmem:[#allocation2 + $0x8] sm:$0xff] %v525_v38  }
  0xa2   :  { %612 = vst [vmem:[#allocation2 + $0x30] sm:$0xff] %v550_v39  }
  0xa5   :  { %v276_v40 = vpop.f32.mrf.mxu2  ;;  %v301_v41 = vpop.f32.mrf.mxu3 }
  0xa6   :  { %v575_v42 = vpack.c.bf16 %v276_v40, %v274_v34  ;;  %v229_v43 = vpop.f32.mrf.mxu0  ;;  %v254_v44 = vpop.f32.mrf.mxu1  ;;  %v600_v45 = vpack.c.bf16 %v301_v41, %v299_v35 }
  0xa8   :  { %617 = vst [vmem:[#allocation2 + $0x58] sm:$0xff] %v575_v42  }
  0xa9   :  { %622 = vst [vmem:[#allocation2 + $0x80] sm:$0xff] %v600_v45  }
  0xad   :  { %v279_v46 = vpop.f32.mrf.mxu2  ;;  %v304_v47 = vpop.f32.mrf.mxu3 }
  0xae   :  { %v231_v48 = vpop.f32.mrf.mxu0  ;;  %v256_v49 = vpop.f32.mrf.mxu1 }
  0xaf   :  { %v530_v50 = vpack.c.bf16 %v231_v48, %v229_v43  ;;  %v555_v51 = vpack.c.bf16 %v256_v49, %v254_v44 }
  0xb1   :  { %608 = vst [vmem:[#allocation2 + $0x10] sm:$0xff] %v530_v50  }
  0xb2   :  { %613 = vst [vmem:[#allocation2 + $0x38] sm:$0xff] %v555_v51  }
  0xb5   :  { %v281_v52 = vpop.f32.mrf.mxu2  ;;  %v306_v53 = vpop.f32.mrf.mxu3 }
  0xb6   :  { %v580_v54 = vpack.c.bf16 %v281_v52, %v279_v46  ;;  %v234_v55 = vpop.f32.mrf.mxu0  ;;  %v259_v56 = vpop.f32.mrf.mxu1  ;;  %v605_v57 = vpack.c.bf16 %v306_v53, %v304_v47 }
  0xb8   :  { %618 = vst [vmem:[#allocation2 + $0x60] sm:$0xff] %v580_v54  }
  0xb9   :  { %623 = vst [vmem:[#allocation2 + $0x88] sm:$0xff] %v605_v57  }
  0xbd   :  { %v284_v58 = vpop.f32.mrf.mxu2 }
  0xbe   :  { %v236_v59 = vpop.f32.mrf.mxu0  ;;  %v261_v60 = vpop.f32.mrf.mxu1 }
  0xbf   :  { %v535_v61 = vpack.c.bf16 %v236_v59, %v234_v55  ;;  %v560_v62 = vpack.c.bf16 %v261_v60, %v259_v56 }
  0xc1   :  { %609 = vst [vmem:[#allocation2 + $0x18] sm:$0xff] %v535_v61  }
  0xc2   :  { %614 = vst [vmem:[#allocation2 + $0x40] sm:$0xff] %v560_v62  }
  0xc5   :  { %v286_v63 = vpop.f32.mrf.mxu2 }
  0xc6   :  { %v585_v0 = vpack.c.bf16 %v286_v63, %v284_v58  ;;  %v239_v1 = vpop.f32.mrf.mxu0  ;;  %v264_v2 = vpop.f32.mrf.mxu1 }
  0xc8   :  { %619 = vst [vmem:[#allocation2 + $0x68] sm:$0xff] %v585_v0  }
  0xcd   :  { %v289_v3 = vpop.f32.mrf.mxu2 }
  0xce   :  { %v241_v4 = vpop.f32.mrf.mxu0  ;;  %v266_v5 = vpop.f32.mrf.mxu1 }
  0xcf   :  { %v540_v6 = vpack.c.bf16 %v241_v4, %v239_v1  ;;  %v565_v7 = vpack.c.bf16 %v266_v5, %v264_v2 }
  0xd1   :  { %610 = vst [vmem:[#allocation2 + $0x20] sm:$0xff] %v540_v6  }
  0xd2   :  { %615 = vst [vmem:[#allocation2 + $0x48] sm:$0xff] %v565_v7  }
  0xd5   :  { %v291_v8 = vpop.f32.mrf.mxu2 }
  0xd6   :  { %v590_v9 = vpack.c.bf16 %v291_v8, %v289_v3 }
  0xd8   :  { %620 = vst [vmem:[#allocation2 + $0x70] sm:$0xff] %v590_v9  }
  0xd9   :  { %393 = dma.vmem_to_hbm [thread:$0]  %s386_s1, 2304, %s388_s22, [#allocation3], %s660_s23, %s660_s23, %s661_s24  }
  0xda   :  { %657 = dma.done.wait [#allocation3], 2304  }
  0xdb   :  { %658 = vsyncadd [#allocation3], 4294964992 }
  0xdc   :  { %398 = vsyncpa [#allocation3], 1 }

</bundles_post_ra>
